<compile_context>
chip_gen: v6e
topology: v6e:2x2x1
jax: 0.10.0
libtpu: 0.0.40
codegen_flags: <defaults>
</compile_context>

<pallas_src>
import jax
import jax.numpy as jnp
from jax.experimental import pallas as pl
from jax.experimental.pallas import tpu as pltpu

_LANE = 128
_SMALL_BYTES = 1 << 20          # below this: single-block kernel, no splitting
_TARGET_BLOCK_BYTES = 4 << 20   # ~4 MiB x-blocks on the tiled paths


def _cdiv(a, b):
    return -(-a // b)


def _round_up(n, m):
    return _cdiv(n, m) * m


def _sublane(dtype):
    # Native sublane tile height: 8 for 4-byte, 16 for 2-byte, 32 for 1-byte.
    return max(8, 32 // jnp.dtype(dtype).itemsize)


def _vmem_limit(need_bytes):
    # Explicit scoped-VMEM budget: need + headroom, floored at the most
    # conservative default (v5e: 16 MiB) and capped below v7x physical VMEM.
    return int(min(max(need_bytes + (4 << 20), 16 << 20), 60 << 20))


def _add_kernel(x_ref, p_ref, o_ref):
    # Elementwise add; p_ref broadcasts over rows when its row dim is 1.
    o_ref[...] = x_ref[...] + p_ref[...]


def _add_flat(x, pos, out_dtype, target_block_bytes, small_bytes):
    """B < sublane-tile (or tiny total): pre-broadcast pos over batch and use a
    fully occupied (rows, lanes) layout so every block is full (sub,128) tiles."""
    B, C, H, W = x.shape
    total = B * C * H * W
    itemsize = jnp.dtype(out_dtype).itemsize
    sub = _sublane(out_dtype)

    xf = x.astype(out_dtype).reshape(-1)
    # Pre-broadcasting pos costs at most (B-1)*D extra HBM reads (B is small or
    # the whole problem is tiny here) but restores full sublane occupancy and
    # unmasked stores -- the bigger measured lever for small elementwise work.
    pf = jnp.broadcast_to(pos.astype(out_dtype), x.shape).reshape(-1)

    if total * itemsize <= small_bytes:
        # One grid step, one (sub, lanes) slab; lanes is a multiple of 128.
        total_pad = _round_up(total, sub * _LANE)
        lanes = total_pad // sub
        block_rows = sub
        n_blk = 1
    else:
        # Lane-dense 1024-wide rows, tiled along rows into ~target-size blocks.
        lanes = 8 * _LANE
        rows = _cdiv(total, lanes)
        n_blk = max(1, _cdiv(rows * lanes * itemsize, target_block_bytes))
        block_rows = _round_up(_cdiv(rows, n_blk), sub)
        n_blk = _cdiv(rows, block_rows)
        total_pad = n_blk * block_rows * lanes

    if total_pad != total:
        xf = jnp.pad(xf, (0, total_pad - total))
        pf = jnp.pad(pf, (0, total_pad - total))
    rows_pad = total_pad // lanes
    x2 = xf.reshape(rows_pad, lanes)
    p2 = pf.reshape(rows_pad, lanes)

    block_bytes = block_rows * lanes * itemsize
    out2 = pl.pallas_call(
        _add_kernel,
        out_shape=jax.ShapeDtypeStruct((rows_pad, lanes), out_dtype),
        grid_spec=pltpu.PrefetchScalarGridSpec(
            num_scalar_prefetch=0,
            grid=(n_blk,),
            in_specs=[
                pl.BlockSpec((block_rows, lanes), lambda i: (i, 0)),
                pl.BlockSpec((block_rows, lanes), lambda i: (i, 0)),
            ],
            out_specs=pl.BlockSpec((block_rows, lanes), lambda i: (i, 0)),
        ),
        compiler_params=pltpu.CompilerParams(
            dimension_semantics=("parallel",),
            vmem_limit_bytes=_vmem_limit(2 * 3 * block_bytes),
        ),
    )(x2, p2)

    return out2.reshape(-1)[:total].reshape(B, C, H, W)


def _add_batched(x, pos, out_dtype, target_block_bytes):
    """B >= sublane tile and non-trivial total: keep pos at 1x HBM traffic via a
    (1, block_d) slab reused across an inner batch grid axis."""
    B, C, H, W = x.shape
    D = C * H * W
    itemsize = jnp.dtype(out_dtype).itemsize
    sub = _sublane(out_dtype)

    x2 = x.astype(out_dtype).reshape(B, D)
    p2 = pos.astype(out_dtype).reshape(1, D)

    # Feature axis: lane-dense blocks (multiple of 128); split only when a
    # sub-row-high slab of the full feature dim would exceed the block target.
    n_d = max(1, _cdiv(D * sub * itemsize, target_block_bytes))
    block_d = _round_up(_cdiv(D, n_d), _LANE)
    n_d = _cdiv(D, block_d)
    D_pad = n_d * block_d

    # Batch axis: sublane-dense row blocks sized so one (block_b, block_d) tile
    # is about the block target -> bounded VMEM even for very large B.
    n_b = max(1, _cdiv(B * block_d * itemsize, target_block_bytes))
    block_b = _round_up(_cdiv(B, n_b), sub)
    n_b = _cdiv(B, block_b)
    B_pad = n_b * block_b

    if D_pad != D:
        x2 = jnp.pad(x2, ((0, 0), (0, D_pad - D)))
        p2 = jnp.pad(p2, ((0, 0), (0, D_pad - D)))
    if B_pad != B:
        x2 = jnp.pad(x2, ((0, B_pad - B), (0, 0)))

    block_bytes = block_b * block_d * itemsize
    vmem_need = 2 * (2 * block_bytes + block_d * itemsize)  # dbl-buffered x/out/pos

    out2 = pl.pallas_call(
        _add_kernel,
        out_shape=jax.ShapeDtypeStruct((B_pad, D_pad), out_dtype),
        grid_spec=pltpu.PrefetchScalarGridSpec(
            num_scalar_prefetch=0,
            # Batch is the inner (last) grid axis; pos's block index is
            # constant along it, so pos is DMA'd once per feature block and the
            # pipeline skips the unchanged copy on consecutive batch steps.
            grid=(n_d, n_b),
            in_specs=[
                pl.BlockSpec((block_b, block_d), lambda j, b: (b, j)),
                pl.BlockSpec((1, block_d), lambda j, b: (0, j)),
            ],
            out_specs=pl.BlockSpec((block_b, block_d), lambda j, b: (b, j)),
        ),
        compiler_params=pltpu.CompilerParams(
            # TODO(synk): on v7x, marking an axis pltpu.CORE_PARALLEL (or using
            # pl.core_map over create_tensorcore_mesh) is what actually shards
            # grid steps across both TensorCores; plain "parallel" is kept here
            # for single-TC (v5e/v6e) portability.
            dimension_semantics=("parallel", "parallel"),
            vmem_limit_bytes=_vmem_limit(vmem_need),
        ),
    )(x2, p2)

    return out2[:B, :D].reshape(B, C, H, W)


def learnable_positional_embedding(x, pos_embed, *,
                                   target_block_bytes=_TARGET_BLOCK_BYTES,
                                   small_bytes=_SMALL_BYTES):
    """Forward of LearnablePositionalEmbedding: x + pos_embed (NCHW), with
    pos_embed broadcast over the batch dimension.

    For tiny inputs a standalone pallas_call can never beat letting XLA fuse
    this broadcast add into a neighboring op; the Pallas path is kept per spec
    but collapses to a single full-tile grid step in that regime.
    """
    B, C, H, W = x.shape
    assert pos_embed.shape == (1, C, H, W)
    # Match PyTorch type promotion (e.g. bf16 x + f32 pos_embed -> f32 result).
    out_dtype = jnp.result_type(x.dtype, pos_embed.dtype)
    itemsize = jnp.dtype(out_dtype).itemsize
    sub = _sublane(out_dtype)

    if B >= sub and B * C * H * W * itemsize > small_bytes:
        return _add_batched(x, pos_embed, out_dtype, target_block_bytes)
    return _add_flat(x, pos_embed, out_dtype, target_block_bytes, small_bytes)


if __name__ == "__main__":
    # Module config: grid_height=16, grid_width=16, num_features=4.
    B, C, H, W = 2, 4, 16, 16

    key = jax.random.PRNGKey(0)
    kx, kp = jax.random.split(key)
    x = jax.random.normal(kx, (B, C, H, W), dtype=jnp.float32)
    # nn.Parameter(torch.zeros(...)) initializes to zeros; use a small
    # deterministic non-zero init so the add is actually exercised.
    pos_embed = 0.01 * jax.random.normal(kp, (1, C, H, W), dtype=jnp.float32)

    out = jax.block_until_ready(learnable_positional_embedding(x, pos_embed))
    ref = x + pos_embed
    assert out.shape == (B, C, H, W)
    assert out.dtype == ref.dtype
    assert jnp.allclose(out, ref, atol=1e-6), "flat-path mismatch vs reference"

    # Also exercise the batched (B >= 8, > 1 MiB) path once at a small size.
    B2, C2, H2, W2 = 32, 16, 32, 32
    kx2, kp2 = jax.random.split(jax.random.PRNGKey(1))
    xb = jax.random.normal(kx2, (B2, C2, H2, W2), dtype=jnp.float32)
    pb = 0.01 * jax.random.normal(kp2, (1, C2, H2, W2), dtype=jnp.float32)
    outb = jax.block_until_ready(learnable_positional_embedding(xb, pb))
    assert jnp.allclose(outb, xb + pb, atol=1e-6), "batched-path mismatch vs reference"

    print("KERNEL_OK")
</pallas_src>

<mosaic_0001>
module attributes {stable_mosaic.version = 11 : i64} {
  func.func @_add_kernel(%arg0: i32, %arg1: memref<8x256xf32, #tpu.memory_space<vmem>>, %arg2: memref<8x256xf32, #tpu.memory_space<vmem>>, %arg3: memref<8x256xf32, #tpu.memory_space<vmem>>) attributes {dimension_semantics = [#tpu.dimension_semantics<parallel>], iteration_bounds = array<i64: 1>, scalar_prefetch = 0 : i64, scratch_operands = 0 : i64, tpu.core_type = #tpu.core_type<tc>, window_params = [{transform_indices = @transform_0, window_bounds = array<i64: 8, 256>}, {transform_indices = @transform_1, window_bounds = array<i64: 8, 256>}, {transform_indices = @transform_2, window_bounds = array<i64: 8, 256>}]} {
    %c0 = arith.constant 0 : index
    %c0_0 = arith.constant 0 : index
    %0 = vector.load %arg1[%c0, %c0_0] : memref<8x256xf32, #tpu.memory_space<vmem>>, vector<8x256xf32>
    %c0_1 = arith.constant 0 : index
    %c0_2 = arith.constant 0 : index
    %1 = vector.load %arg2[%c0_1, %c0_2] : memref<8x256xf32, #tpu.memory_space<vmem>>, vector<8x256xf32>
    %2 = arith.addf %0, %1 : vector<8x256xf32>
    %c0_3 = arith.constant 0 : index
    %c0_4 = arith.constant 0 : index
    %3 = vector.load %arg3[%c0_3, %c0_4] : memref<8x256xf32, #tpu.memory_space<vmem>>, vector<8x256xf32>
    tpu.vector_store %arg3[%c0_3, %c0_4], %2 {strides = array<i32>} : memref<8x256xf32, #tpu.memory_space<vmem>>, vector<8x256xf32>,
    return
  }
  func.func @transform_0(%arg0: i32) -> (i32, i32) {
    %c0_i32 = arith.constant 0 : i32
    %c0_i32_0 = arith.constant 0 : i32
    return %arg0, %c0_i32 : i32, i32
  }
  func.func @transform_1(%arg0: i32) -> (i32, i32) {
    %c0_i32 = arith.constant 0 : i32
    %c0_i32_0 = arith.constant 0 : i32
    return %arg0, %c0_i32 : i32, i32
  }
  func.func @transform_2(%arg0: i32) -> (i32, i32) {
    %c0_i32 = arith.constant 0 : i32
    %c0_i32_0 = arith.constant 0 : i32
    return %arg0, %c0_i32 : i32, i32
  }
}

</mosaic_0001>

<bundles_post_ra>
// kernel: tpu_custom_call.1
= control target key start
LH: loop header
LB: loop body
LE: loop exit
PB: predicated region body
PF: predicated region fallthrough
CT: control target
= control target key end

     0   :  { %7 = vsyncpa [#allocation3], 0  ;;  %s156_s0 = inlined_call_operand.hbm [shape: f32[8,256], index: 0, kind: input, shape index: {}]   ;;  %s157_s1 = inlined_call_operand.hbm [shape: f32[8,256], index: 1, kind: input, shape index: {}]   ;;  %s158_s2 = inlined_call_operand.hbm [shape: f32[8,256], index: 2, kind: output, shape index: {}]  }
   0x1   :  { %8 = vsyncpa [#allocation6], 0 }
   0x2   :  { %9 = vsyncpa [#allocation4], 0  ;;  %s129_s9 = smov [#allocation2]   ;;  %s130_s11 = smov [#allocation5]  }
   0x3   :  { %s16_s10 = sshll.u32 %s129_s9, 4  ;;  %s26_s12 = sshll.u32 %s130_s11, 4  ;;  %s17_s10 = int_to_ptr.vmem [resolvable:$true] %s16_s10  ;;  %s27_s12 = int_to_ptr.vmem [resolvable:$true] %s26_s12 }
   0x4   :  { %s71_s13 = scalar_lea.vmem %s17_s10, 256  ;;  %p76_p1 = scmp.lt.s32.totalorder %s17_s10, %s17_s10 }
   0x5   :  { %p72_p0 = scmp.ne.s32.totalorder %s17_s10, %s71_s13  ;;  %p77_p2 = scmp.lt.s32.totalorder %s71_s13, %s71_s13 }
   0x7   :  { %p78_p3 = por %p77_p2, %p76_p1 }
   0x9   :  { %p79_p4 = pnand %p78_p3, %p72_p0 }
   0xb   :  { %82 = shalt.err (!%p79_p4)
}
   0xc   :  { %19 = dma.hbm_to_vmem [thread:$0]  %s156_s0, 256, %s17_s10, [#allocation3]  }
   0xd   :  { %s91_s16 = scalar_lea.vmem %s27_s12, 256  ;;  %p96_p6 = scmp.lt.s32.totalorder %s27_s12, %s27_s12 }
   0xe   :  { %p92_p5 = scmp.ne.s32.totalorder %s27_s12, %s91_s16  ;;  %p97_p7 = scmp.lt.s32.totalorder %s91_s16, %s91_s16 }
  0x10   :  { %p98_p8 = por %p97_p7, %p96_p6 }
  0x12   :  { %p99_p9 = pnand %p98_p8, %p92_p5 }
  0x14   :  { %102 = shalt.err (!%p99_p9)
}
  0x15   :  { %29 = dma.hbm_to_vmem [thread:$0]  %s157_s1, 256, %s27_s12, [#allocation6]  }
  0x16   :  { %123 = dma.done.wait [#allocation3], 256  }
  0x17   :  { %124 = vsyncadd [#allocation3], 4294967040 }
  0x18   :  { %125 = dma.done.wait [#allocation6], 256  }
  0x19   :  { %126 = vsyncadd [#allocation6], 4294967040  ;;  %s131_s19 = smov [#allocation7]   ;;  %v36_v0 = vld [vmem:[#allocation2] sm:$0xff]  ;;  %v38_v1 = vld [vmem:[#allocation5] sm:$0xff] }
  0x1a   :  { %s50_s20 = sshll.u32 %s131_s19, 4  ;;  %v37_v2 = vld [vmem:[#allocation2 + $0x8] sm:$0xff]  ;;  %v40_v3 = vadd.f32 %v38_v1, %v36_v0  ;;  %v39_v4 = vld [vmem:[#allocation5 + $0x8] sm:$0xff]  ;;  %s51_s20 = int_to_ptr.vmem [resolvable:$true] %s50_s20 }
  0x1b   :  { %v41_v5 = vadd.f32 %v39_v4, %v37_v2  ;;  %s103_s0 = scalar_lea.vmem %s51_s20, 256  ;;  %p108_p11 = scmp.lt.s32.totalorder %s51_s20, %s51_s20 }
  0x1c   :  { %42 = vst [vmem:[#allocation7] sm:$0xff] %v40_v3  ;;  %p104_p10 = scmp.ne.s32.totalorder %s51_s20, %s103_s0  ;;  %p109_p12 = scmp.lt.s32.totalorder %s103_s0, %s103_s0 }
  0x1d   :  { %43 = vst [vmem:[#allocation7 + $0x8] sm:$0xff] %v41_v5 }
  0x1e   :  { %p110_p13 = por %p109_p12, %p108_p11 }
  0x20   :  { %p111_p0 = pnand %p110_p13, %p104_p10 }
  0x22   :  { %114 = shalt.err (!%p111_p0)
}
  0x23   :  { %53 = dma.vmem_to_hbm [thread:$0]  %s51_s20, 256, %s158_s2, [#allocation4]  }
  0x24   :  { %127 = dma.done.wait [#allocation4], 256  }
  0x25   :  { %128 = vsyncadd [#allocation4], 4294967040 }
  0x26   :  { %57 = vsyncpa [#allocation3], 1 }
  0x27   :  { %58 = vsyncpa [#allocation6], 1 }
  0x28   :  { %59 = vsyncpa [#allocation4], 1 }

</bundles_post_ra>
